<compile_context>
chip_gen: v5e
topology: v5e:2x2
jax: 0.10.0
libtpu: 0.0.40
codegen_flags: <defaults>
</compile_context>

<pallas_src>
import functools

import jax
import jax.numpy as jnp
from jax.experimental import pallas as pl
from jax.experimental.pallas import tpu as pltpu


def _elu(x):
    return jnp.where(x > 0, x, jnp.exp(x) - 1.0)


def _masked_softmax_pv(f_src, f_dst_row, bias, values_mm, alpha, mm_dtype,
                       approx_recip):
    """LeakyReLU -> additive adjacency bias -> softmax -> PV.

    Normalization (1/rowsum) is applied AFTER the PV matmul, avoiding the NxN
    divide of the classic formulation.
    """
    e = f_src + f_dst_row                              # [N, N]
    e = jnp.maximum(e, alpha * e)                      # LeakyReLU (0 < alpha < 1)
    e = e + bias                                       # adjacency mask as additive bias
    m = jnp.max(e, axis=-1, keepdims=True)
    p = jnp.exp(e - m)
    l = jnp.sum(p, axis=-1, keepdims=True)
    inv_l = pl.reciprocal(l, approx=True) if approx_recip else 1.0 / l
    pv = jnp.dot(p.astype(mm_dtype), values_mm, preferred_element_type=jnp.float32)
    return pv * inv_l


def _gat_kernel(x_ref, adj_ref, w_all_ref, a_all_ref, w_out_ref, a_out_ref,
                o_ref, *, nheads, nhid, alpha, batch_block, node_num,
                mm_dtype, approx_recip):
    f32 = jnp.float32
    neg_inf = jnp.float32(-9e15)
    N = node_num
    H = nheads

    # TODO(synk): F.dropout on inputs / attention skipped (eval mode, identity).

    # ---- phase 1: batch-fused projection + score matmuls (one MXU op each) --
    x = x_ref[...].reshape(batch_block * N, x_ref.shape[-1]).astype(mm_dtype)
    wh_all = jnp.dot(x, w_all_ref[...], preferred_element_type=f32)      # [B*N, H*nhid]
    wh_mm = wh_all.astype(mm_dtype)
    # column h = f_src of head h, column H+h = f_dst of head h
    scores = jnp.dot(wh_mm, a_all_ref[...], preferred_element_type=f32)  # [B*N, 2H]
    scores_t = scores.T                                                  # [2H, B*N] (one transpose)

    # ---- phase 2: per-batch masked softmax + PV (adj differs per b) ---------
    biases = []
    head_rows = []
    for b in range(batch_block):                       # static unroll (small)
        # adjacency bias hoisted out of the per-head loop
        bias = jnp.where(adj_ref[b].astype(f32) > 0, 0.0, neg_inf)       # [N, N]
        biases.append(bias)
        wh_b = wh_mm[b * N:(b + 1) * N, :]
        heads = []
        for h in range(H):
            head = _masked_softmax_pv(
                scores[b * N:(b + 1) * N, h:h + 1],                      # f_src [N,1]
                scores_t[H + h:H + h + 1, b * N:(b + 1) * N],            # f_dst [1,N]
                bias, wh_b[:, h * nhid:(h + 1) * nhid],
                alpha, mm_dtype, approx_recip)
            heads.append(_elu(head))                   # concat=True -> ELU, [N, nhid]
        head_rows.append(jnp.concatenate(heads, axis=-1))                # [N, H*nhid]

    # ---- phase 3: single output projection / score matmul for whole block ---
    head_cat = head_rows[0] if batch_block == 1 else jnp.concatenate(head_rows, axis=0)
    head_cat_mm = head_cat.astype(mm_dtype)            # [B*N, H*nhid]
    wh_o = jnp.dot(head_cat_mm, w_out_ref[...], preferred_element_type=f32)  # [B*N, F_pad]
    wh_o_mm = wh_o.astype(mm_dtype)
    s_o = jnp.dot(wh_o_mm, a_out_ref[...], preferred_element_type=f32)       # [B*N, 2]
    s_o_t = s_o.T                                                             # [2, B*N]

    # ---- phase 4: output attention + log_softmax(dim=1) per batch element ---
    for b in range(batch_block):
        y = _elu(_masked_softmax_pv(                   # F.elu(out_att(...)), [N, F_pad]
            s_o[b * N:(b + 1) * N, 0:1],
            s_o_t[1:2, b * N:(b + 1) * N],
            biases[b], wh_o_mm[b * N:(b + 1) * N, :],
            alpha, mm_dtype, approx_recip))
        # F.log_softmax(x, dim=1) -> node axis (axis 0 of this tile).
        # Padded feature columns produce harmless -log(N); sliced off outside.
        m = jnp.max(y, axis=0, keepdims=True)
        lse = jnp.log(jnp.sum(jnp.exp(y - m), axis=0, keepdims=True)) + m
        o_ref[b] = y - lse


@functools.partial(jax.jit, static_argnames=("alpha", "batch_block", "matmul_dtype"))
def gat_forward(x, adj, w_att, a_src, a_dst, w_out, a_osrc, a_odst, *,
                alpha, batch_block=None, matmul_dtype=jnp.bfloat16):
    B, N, F_in = x.shape
    nheads, _, nhid = w_att.shape
    F_out = w_out.shape[-1]
    F_pad = 128 * pl.cdiv(F_out, 128)          # lane-dense output width

    if batch_block is None:
        # grid length >= 2 on the "parallel" axis keeps both of v7x's
        # TensorCores busy; on v5e/v6e the extra grid step costs ~0.35us.
        batch_block = max(1, B // 2)
    assert B % batch_block == 0

    # adjacency ships as a bf16 0/1 mask: halves the only O(N^2) input's DMA.
    adj_mask = (adj > 0).astype(jnp.bfloat16)

    # ---- prepack parameters (fused / block-structured / lane-padded) -------
    # fused per-head projection: w_all[:, h*nhid:(h+1)*nhid] == w_att[h]
    w_all = jnp.transpose(w_att, (1, 0, 2)).reshape(F_in, nheads * nhid)
    # block-structured score projection (one matmul gives every head's f_src/f_dst)
    a_all = jnp.zeros((nheads * nhid, 2 * nheads), jnp.float32)
    for h in range(nheads):
        a_all = a_all.at[h * nhid:(h + 1) * nhid, h].set(a_src[h])
        a_all = a_all.at[h * nhid:(h + 1) * nhid, nheads + h].set(a_dst[h])
    # output projection / output attention vectors, zero-padded to F_pad lanes
    w_out_p = jnp.zeros((nheads * nhid, F_pad), jnp.float32).at[:, :F_out].set(w_out)
    a_out = (jnp.zeros((F_pad, 2), jnp.float32)
             .at[:F_out, 0].set(a_osrc[0])
             .at[:F_out, 1].set(a_odst[0]))

    # cast weights once outside the kernel (halves weight DMA on the bf16 path)
    w_all = w_all.astype(matmul_dtype)
    a_all = a_all.astype(matmul_dtype)
    w_out_p = w_out_p.astype(matmul_dtype)
    a_out = a_out.astype(matmul_dtype)

    # approx reciprocal only when bf16 error already dominates (keeps f32 exact)
    approx_recip = jnp.dtype(matmul_dtype) != jnp.dtype(jnp.float32)

    # VMEM budget: double-buffered in/out blocks + weights + f32 temporaries,
    # floored at the smallest per-chip scoped default, capped under v7x's 64 MiB.
    mm_bytes = jnp.dtype(matmul_dtype).itemsize
    io_bytes = batch_block * N * (F_in * 4 + N * 2 + F_pad * 4)
    w_bytes = (w_all.size + a_all.size + w_out_p.size + a_out.size) * mm_bytes
    tmp_bytes = batch_block * N * (2 * N + nheads * nhid + 3 * F_pad) * 4
    vmem_limit = int(min(48 * 2**20,
                         max(16 * 2**20,
                             2 * (io_bytes + w_bytes) + tmp_bytes + (2 << 20))))

    kernel = functools.partial(
        _gat_kernel, nheads=nheads, nhid=nhid, alpha=alpha,
        batch_block=batch_block, node_num=N, mm_dtype=matmul_dtype,
        approx_recip=approx_recip)
    out_pad = pl.pallas_call(
        kernel,
        out_shape=jax.ShapeDtypeStruct((B, N, F_pad), jnp.float32),
        grid=(B // batch_block,),
        in_specs=[
            pl.BlockSpec((batch_block, N, F_in), lambda b: (b, 0, 0)),
            pl.BlockSpec((batch_block, N, N), lambda b: (b, 0, 0)),
            pl.BlockSpec((F_in, nheads * nhid), lambda b: (0, 0)),
            pl.BlockSpec((nheads * nhid, 2 * nheads), lambda b: (0, 0)),
            pl.BlockSpec((nheads * nhid, F_pad), lambda b: (0, 0)),
            pl.BlockSpec((F_pad, 2), lambda b: (0, 0)),
        ],
        out_specs=pl.BlockSpec((batch_block, N, F_pad), lambda b: (b, 0, 0)),
        compiler_params=pltpu.CompilerParams(
            dimension_semantics=("parallel",),
            vmem_limit_bytes=vmem_limit),
    )(x, adj_mask, w_all, a_all, w_out_p, a_out)
    # keep the pad-slice adjacent to the pallas_call: padded columns hold -log(N)
    return out_pad[..., :F_out]


# ----- pure-JAX reference (for correctness check) ----------------------------
def _ref_attention(h_feat, adj, a_src, a_dst, alpha):
    f_src = jnp.einsum("bnd,d->bn", h_feat, a_src)[:, :, None]
    f_dst = jnp.einsum("bnd,d->bn", h_feat, a_dst)[:, None, :]
    e = jnp.where(f_src + f_dst > 0, f_src + f_dst, alpha * (f_src + f_dst))
    e = jnp.where(adj > 0, e, -9e15)
    attn = jax.nn.softmax(e, axis=-1)
    return jnp.einsum("bnm,bmd->bnd", attn, h_feat)


def gat_reference(x, adj, w_att, a_src, a_dst, w_out, a_osrc, a_odst, *, alpha):
    nheads = w_att.shape[0]
    heads = []
    for h in range(nheads):
        wh = jnp.einsum("bnf,fd->bnd", x, w_att[h])
        heads.append(jax.nn.elu(_ref_attention(wh, adj, a_src[h], a_dst[h], alpha)))
    h_cat = jnp.concatenate(heads, axis=-1)
    wh_o = jnp.einsum("bnf,fd->bnd", h_cat, w_out)
    y = jax.nn.elu(_ref_attention(wh_o, adj, a_osrc[0], a_odst[0], alpha))
    return jax.nn.log_softmax(y, axis=1)


if __name__ == "__main__":
    B, N = 2, 8                     # batch_num, node_num
    F_in, nhid, nheads, F_out = 16, 8, 4, 8
    alpha = 0.2                     # LeakyReLU negative slope

    key = jax.random.PRNGKey(0)
    ks = jax.random.split(key, 7)
    x = jax.random.normal(ks[0], (B, N, F_in), jnp.float32)
    adj = jnp.ones((B, N, N), jnp.float32)        # nn.Parameter(torch.ones(B,N,N))

    # Deterministic synthetic parameters (GraphAttentionLayer: W [in,out], a [2*out,1]).
    w_att = jax.random.normal(ks[1], (nheads, F_in, nhid), jnp.float32) * 0.3
    a_src = jax.random.normal(ks[2], (nheads, nhid), jnp.float32) * 0.3   # a[:out]
    a_dst = jax.random.normal(ks[3], (nheads, nhid), jnp.float32) * 0.3   # a[out:]
    w_out = jax.random.normal(ks[4], (nheads * nhid, F_out), jnp.float32) * 0.3
    a_osrc = jax.random.normal(ks[5], (1, F_out), jnp.float32) * 0.3
    a_odst = jax.random.normal(ks[6], (1, F_out), jnp.float32) * 0.3

    ref = gat_reference(x, adj, w_att, a_src, a_dst, w_out, a_osrc, a_odst, alpha=alpha)

    # f32 MXU operands, exact reciprocal: tight check vs the pure-JAX reference.
    out_f32 = gat_forward(x, adj, w_att, a_src, a_dst, w_out, a_osrc, a_odst,
                          alpha=alpha, matmul_dtype=jnp.float32)
    jax.block_until_ready(out_f32)
    assert out_f32.shape == (B, N, F_out)
    assert jnp.allclose(out_f32, ref, atol=5e-4, rtol=5e-4), "f32 kernel mismatch"

    # bf16 MXU operands, f32 accumulation, approx reciprocal (v6e/v7x throughput
    # path): loose sanity tolerance since bf16 casts propagate ~1e-2 abs error.
    out_bf16 = gat_forward(x, adj, w_att, a_src, a_dst, w_out, a_osrc, a_odst,
                           alpha=alpha, matmul_dtype=jnp.bfloat16)
    jax.block_until_ready(out_bf16)
    assert out_bf16.shape == (B, N, F_out)
    assert jnp.allclose(out_bf16, ref, atol=1e-1, rtol=1e-1), "bf16 kernel mismatch"

    print("KERNEL_OK")
</pallas_src>

<mosaic_0001>
module attributes {stable_mosaic.version = 11 : i64} {
  func.func @_gat_kernel(%arg0: i32, %arg1: memref<1x8x16xf32, #tpu.memory_space<vmem>>, %arg2: memref<1x8x8xbf16, #tpu.memory_space<vmem>>, %arg3: memref<16x32xf32, #tpu.memory_space<vmem>>, %arg4: memref<32x8xf32, #tpu.memory_space<vmem>>, %arg5: memref<32x128xf32, #tpu.memory_space<vmem>>, %arg6: memref<128x2xf32, #tpu.memory_space<vmem>>, %arg7: memref<1x8x128xf32, #tpu.memory_space<vmem>>) attributes {dimension_semantics = [#tpu.dimension_semantics<parallel>], iteration_bounds = array<i64: 2>, scalar_prefetch = 0 : i64, scratch_operands = 0 : i64, tpu.core_type = #tpu.core_type<tc>, window_params = [{transform_indices = @transform_0, window_bounds = array<i64: 1, 8, 16>}, {transform_indices = @transform_1, window_bounds = array<i64: 1, 8, 8>}, {pipeline_mode = #tpu.pipeline_mode<synchronous>, transform_indices = @transform_2, window_bounds = array<i64: 16, 32>}, {pipeline_mode = #tpu.pipeline_mode<synchronous>, transform_indices = @transform_3, window_bounds = array<i64: 32, 8>}, {pipeline_mode = #tpu.pipeline_mode<synchronous>, transform_indices = @transform_4, window_bounds = array<i64: 32, 128>}, {pipeline_mode = #tpu.pipeline_mode<synchronous>, transform_indices = @transform_5, window_bounds = array<i64: 128, 2>}, {transform_indices = @transform_6, window_bounds = array<i64: 1, 8, 128>}]} {
    %c0 = arith.constant 0 : index
    %c0_0 = arith.constant 0 : index
    %c0_1 = arith.constant 0 : index
    %0 = vector.load %arg1[%c0, %c0_0, %c0_1] : memref<1x8x16xf32, #tpu.memory_space<vmem>>, vector<1x8x16xf32>
    %1 = vector.shape_cast %0 : vector<1x8x16xf32> to vector<8x16xf32>
    %c0_2 = arith.constant 0 : index
    %c0_3 = arith.constant 0 : index
    %2 = vector.load %arg3[%c0_2, %c0_3] : memref<16x32xf32, #tpu.memory_space<vmem>>, vector<16x32xf32>
    %cst = arith.constant dense<0.000000e+00> : vector<8x32xf32>
    %3 = tpu.matmul %1, %2, %cst {dimension_numbers = #tpu.dot_dimension_numbers<[1], [0], [0], [1], [0, 0, 1, 1], [], []>} : vector<8x16xf32>, vector<16x32xf32>, vector<8x32xf32> -> vector<8x32xf32>
    %c0_4 = arith.constant 0 : index
    %c0_5 = arith.constant 0 : index
    %4 = vector.load %arg4[%c0_4, %c0_5] : memref<32x8xf32, #tpu.memory_space<vmem>>, vector<32x8xf32>
    %cst_6 = arith.constant dense<0.000000e+00> : vector<8x8xf32>
    %5 = tpu.matmul %3, %4, %cst_6 {dimension_numbers = #tpu.dot_dimension_numbers<[1], [0], [0], [1], [0, 0, 1, 1], [], []>} : vector<8x32xf32>, vector<32x8xf32>, vector<8x8xf32> -> vector<8x8xf32>
    %6 = tpu.transpose %5, [1, 0] : vector<8x8xf32> -> vector<8x8xf32>
    %c0_7 = arith.constant 0 : index
    %c0_8 = arith.constant 0 : index
    %c0_9 = arith.constant 0 : index
    %7 = vector.load %arg2[%c0_7, %c0_8, %c0_9] : memref<1x8x8xbf16, #tpu.memory_space<vmem>>, vector<1x8x8xbf16>
    %8 = vector.shape_cast %7 : vector<1x8x8xbf16> to vector<8x8xbf16>
    %9 = arith.extf %8 : vector<8x8xbf16> to vector<8x8xf32>
    %cst_10 = arith.constant 0.000000e+00 : f32
    %10 = vector.broadcast %cst_10 : f32 to vector<8x8xf32>
    %11 = arith.cmpf ogt, %9, %10 : vector<8x8xf32>
    %cst_11 = arith.constant 0.000000e+00 : f32
    %cst_12 = arith.constant -9.000000e+15 : f32
    %12 = vector.broadcast %cst_11 : f32 to vector<8x8xf32>
    %13 = vector.broadcast %cst_12 : f32 to vector<8x8xf32>
    %14 = arith.select %11, %12, %13 : vector<8x8xi1>, vector<8x8xf32>
    %15 = vector.extract_strided_slice %5 {offsets = [0, 0], sizes = [8, 1], strides = [1, 1]} : vector<8x8xf32> to vector<8x1xf32>
    %16 = vector.extract_strided_slice %6 {offsets = [4, 0], sizes = [1, 8], strides = [1, 1]} : vector<8x8xf32> to vector<1x8xf32>
    %17 = vector.extract_strided_slice %3 {offsets = [0, 0], sizes = [8, 8], strides = [1, 1]} : vector<8x32xf32> to vector<8x8xf32>
    %18 = vector.broadcast %15 : vector<8x1xf32> to vector<8x8xf32>
    %19 = vector.broadcast %16 : vector<1x8xf32> to vector<8x8xf32>
    %20 = arith.addf %18, %19 : vector<8x8xf32>
    %cst_13 = arith.constant 2.000000e-01 : f32
    %21 = vector.broadcast %cst_13 : f32 to vector<8x8xf32>
    %22 = arith.mulf %21, %20 : vector<8x8xf32>
    %23 = arith.maximumf %20, %22 : vector<8x8xf32>
    %24 = arith.addf %23, %14 : vector<8x8xf32>
    %cst_14 = arith.constant dense<0xFF800000> : vector<8xf32>
    %25 = vector.multi_reduction <maximumf>, %24, %cst_14 [1] : vector<8x8xf32> to vector<8xf32>
    %26 = vector.shape_cast %25 : vector<8xf32> to vector<8x1xf32>
    %27 = vector.broadcast %26 : vector<8x1xf32> to vector<8x8xf32>
    %28 = arith.subf %24, %27 : vector<8x8xf32>
    %29 = math.exp %28 : vector<8x8xf32>
    %cst_15 = arith.constant dense<0.000000e+00> : vector<8xf32>
    %30 = vector.multi_reduction <add>, %29, %cst_15 [1] : vector<8x8xf32> to vector<8xf32>
    %31 = vector.shape_cast %30 : vector<8xf32> to vector<8x1xf32>
    %cst_16 = arith.constant 1.000000e+00 : f32
    %32 = vector.broadcast %cst_16 : f32 to vector<8x1xf32>
    %33 = arith.divf %32, %31 : vector<8x1xf32>
    %cst_17 = arith.constant dense<0.000000e+00> : vector<8x8xf32>
    %34 = tpu.matmul %29, %17, %cst_17 {dimension_numbers = #tpu.dot_dimension_numbers<[1], [0], [0], [1], [0, 0, 1, 1], [], []>} : vector<8x8xf32>, vector<8x8xf32>, vector<8x8xf32> -> vector<8x8xf32>
    %35 = vector.broadcast %33 : vector<8x1xf32> to vector<8x8xf32>
    %36 = arith.mulf %34, %35 : vector<8x8xf32>
    %cst_18 = arith.constant 0.000000e+00 : f32
    %37 = vector.broadcast %cst_18 : f32 to vector<8x8xf32>
    %38 = arith.cmpf ogt, %36, %37 : vector<8x8xf32>
    %39 = math.exp %36 : vector<8x8xf32>
    %cst_19 = arith.constant 1.000000e+00 : f32
    %40 = vector.broadcast %cst_19 : f32 to vector<8x8xf32>
    %41 = arith.subf %39, %40 : vector<8x8xf32>
    %42 = arith.select %38, %36, %41 : vector<8x8xi1>, vector<8x8xf32>
    %43 = vector.extract_strided_slice %5 {offsets = [0, 1], sizes = [8, 1], strides = [1, 1]} : vector<8x8xf32> to vector<8x1xf32>
    %44 = vector.extract_strided_slice %6 {offsets = [5, 0], sizes = [1, 8], strides = [1, 1]} : vector<8x8xf32> to vector<1x8xf32>
    %45 = vector.extract_strided_slice %3 {offsets = [0, 8], sizes = [8, 8], strides = [1, 1]} : vector<8x32xf32> to vector<8x8xf32>
    %46 = vector.broadcast %43 : vector<8x1xf32> to vector<8x8xf32>
    %47 = vector.broadcast %44 : vector<1x8xf32> to vector<8x8xf32>
    %48 = arith.addf %46, %47 : vector<8x8xf32>
    %cst_20 = arith.constant 2.000000e-01 : f32
    %49 = vector.broadcast %cst_20 : f32 to vector<8x8xf32>
    %50 = arith.mulf %49, %48 : vector<8x8xf32>
    %51 = arith.maximumf %48, %50 : vector<8x8xf32>
    %52 = arith.addf %51, %14 : vector<8x8xf32>
    %cst_21 = arith.constant dense<0xFF800000> : vector<8xf32>
    %53 = vector.multi_reduction <maximumf>, %52, %cst_21 [1] : vector<8x8xf32> to vector<8xf32>
    %54 = vector.shape_cast %53 : vector<8xf32> to vector<8x1xf32>
    %55 = vector.broadcast %54 : vector<8x1xf32> to vector<8x8xf32>
    %56 = arith.subf %52, %55 : vector<8x8xf32>
    %57 = math.exp %56 : vector<8x8xf32>
    %cst_22 = arith.constant dense<0.000000e+00> : vector<8xf32>
    %58 = vector.multi_reduction <add>, %57, %cst_22 [1] : vector<8x8xf32> to vector<8xf32>
    %59 = vector.shape_cast %58 : vector<8xf32> to vector<8x1xf32>
    %cst_23 = arith.constant 1.000000e+00 : f32
    %60 = vector.broadcast %cst_23 : f32 to vector<8x1xf32>
    %61 = arith.divf %60, %59 : vector<8x1xf32>
    %cst_24 = arith.constant dense<0.000000e+00> : vector<8x8xf32>
    %62 = tpu.matmul %57, %45, %cst_24 {dimension_numbers = #tpu.dot_dimension_numbers<[1], [0], [0], [1], [0, 0, 1, 1], [], []>} : vector<8x8xf32>, vector<8x8xf32>, vector<8x8xf32> -> vector<8x8xf32>
    %63 = vector.broadcast %61 : vector<8x1xf32> to vector<8x8xf32>
    %64 = arith.mulf %62, %63 : vector<8x8xf32>
    %cst_25 = arith.constant 0.000000e+00 : f32
    %65 = vector.broadcast %cst_25 : f32 to vector<8x8xf32>
    %66 = arith.cmpf ogt, %64, %65 : vector<8x8xf32>
    %67 = math.exp %64 : vector<8x8xf32>
    %cst_26 = arith.constant 1.000000e+00 : f32
    %68 = vector.broadcast %cst_26 : f32 to vector<8x8xf32>
    %69 = arith.subf %67, %68 : vector<8x8xf32>
    %70 = arith.select %66, %64, %69 : vector<8x8xi1>, vector<8x8xf32>
    %71 = vector.extract_strided_slice %5 {offsets = [0, 2], sizes = [8, 1], strides = [1, 1]} : vector<8x8xf32> to vector<8x1xf32>
    %72 = vector.extract_strided_slice %6 {offsets = [6, 0], sizes = [1, 8], strides = [1, 1]} : vector<8x8xf32> to vector<1x8xf32>
    %73 = vector.extract_strided_slice %3 {offsets = [0, 16], sizes = [8, 8], strides = [1, 1]} : vector<8x32xf32> to vector<8x8xf32>
    %74 = vector.broadcast %71 : vector<8x1xf32> to vector<8x8xf32>
    %75 = vector.broadcast %72 : vector<1x8xf32> to vector<8x8xf32>
    %76 = arith.addf %74, %75 : vector<8x8xf32>
    %cst_27 = arith.constant 2.000000e-01 : f32
    %77 = vector.broadcast %cst_27 : f32 to vector<8x8xf32>
    %78 = arith.mulf %77, %76 : vector<8x8xf32>
    %79 = arith.maximumf %76, %78 : vector<8x8xf32>
    %80 = arith.addf %79, %14 : vector<8x8xf32>
    %cst_28 = arith.constant dense<0xFF800000> : vector<8xf32>
    %81 = vector.multi_reduction <maximumf>, %80, %cst_28 [1] : vector<8x8xf32> to vector<8xf32>
    %82 = vector.shape_cast %81 : vector<8xf32> to vector<8x1xf32>
    %83 = vector.broadcast %82 : vector<8x1xf32> to vector<8x8xf32>
    %84 = arith.subf %80, %83 : vector<8x8xf32>
    %85 = math.exp %84 : vector<8x8xf32>
    %cst_29 = arith.constant dense<0.000000e+00> : vector<8xf32>
    %86 = vector.multi_reduction <add>, %85, %cst_29 [1] : vector<8x8xf32> to vector<8xf32>
    %87 = vector.shape_cast %86 : vector<8xf32> to vector<8x1xf32>
    %cst_30 = arith.constant 1.000000e+00 : f32
    %88 = vector.broadcast %cst_30 : f32 to vector<8x1xf32>
    %89 = arith.divf %88, %87 : vector<8x1xf32>
    %cst_31 = arith.constant dense<0.000000e+00> : vector<8x8xf32>
    %90 = tpu.matmul %85, %73, %cst_31 {dimension_numbers = #tpu.dot_dimension_numbers<[1], [0], [0], [1], [0, 0, 1, 1], [], []>} : vector<8x8xf32>, vector<8x8xf32>, vector<8x8xf32> -> vector<8x8xf32>
    %91 = vector.broadcast %89 : vector<8x1xf32> to vector<8x8xf32>
    %92 = arith.mulf %90, %91 : vector<8x8xf32>
    %cst_32 = arith.constant 0.000000e+00 : f32
    %93 = vector.broadcast %cst_32 : f32 to vector<8x8xf32>
    %94 = arith.cmpf ogt, %92, %93 : vector<8x8xf32>
    %95 = math.exp %92 : vector<8x8xf32>
    %cst_33 = arith.constant 1.000000e+00 : f32
    %96 = vector.broadcast %cst_33 : f32 to vector<8x8xf32>
    %97 = arith.subf %95, %96 : vector<8x8xf32>
    %98 = arith.select %94, %92, %97 : vector<8x8xi1>, vector<8x8xf32>
    %99 = vector.extract_strided_slice %5 {offsets = [0, 3], sizes = [8, 1], strides = [1, 1]} : vector<8x8xf32> to vector<8x1xf32>
    %100 = vector.extract_strided_slice %6 {offsets = [7, 0], sizes = [1, 8], strides = [1, 1]} : vector<8x8xf32> to vector<1x8xf32>
    %101 = vector.extract_strided_slice %3 {offsets = [0, 24], sizes = [8, 8], strides = [1, 1]} : vector<8x32xf32> to vector<8x8xf32>
    %102 = vector.broadcast %99 : vector<8x1xf32> to vector<8x8xf32>
    %103 = vector.broadcast %100 : vector<1x8xf32> to vector<8x8xf32>
    %104 = arith.addf %102, %103 : vector<8x8xf32>
    %cst_34 = arith.constant 2.000000e-01 : f32
    %105 = vector.broadcast %cst_34 : f32 to vector<8x8xf32>
    %106 = arith.mulf %105, %104 : vector<8x8xf32>
    %107 = arith.maximumf %104, %106 : vector<8x8xf32>
    %108 = arith.addf %107, %14 : vector<8x8xf32>
    %cst_35 = arith.constant dense<0xFF800000> : vector<8xf32>
    %109 = vector.multi_reduction <maximumf>, %108, %cst_35 [1] : vector<8x8xf32> to vector<8xf32>
    %110 = vector.shape_cast %109 : vector<8xf32> to vector<8x1xf32>
    %111 = vector.broadcast %110 : vector<8x1xf32> to vector<8x8xf32>
    %112 = arith.subf %108, %111 : vector<8x8xf32>
    %113 = math.exp %112 : vector<8x8xf32>
    %cst_36 = arith.constant dense<0.000000e+00> : vector<8xf32>
    %114 = vector.multi_reduction <add>, %113, %cst_36 [1] : vector<8x8xf32> to vector<8xf32>
    %115 = vector.shape_cast %114 : vector<8xf32> to vector<8x1xf32>
    %cst_37 = arith.constant 1.000000e+00 : f32
    %116 = vector.broadcast %cst_37 : f32 to vector<8x1xf32>
    %117 = arith.divf %116, %115 : vector<8x1xf32>
    %cst_38 = arith.constant dense<0.000000e+00> : vector<8x8xf32>
    %118 = tpu.matmul %113, %101, %cst_38 {dimension_numbers = #tpu.dot_dimension_numbers<[1], [0], [0], [1], [0, 0, 1, 1], [], []>} : vector<8x8xf32>, vector<8x8xf32>, vector<8x8xf32> -> vector<8x8xf32>
    %119 = vector.broadcast %117 : vector<8x1xf32> to vector<8x8xf32>
    %120 = arith.mulf %118, %119 : vector<8x8xf32>
    %cst_39 = arith.constant 0.000000e+00 : f32
    %121 = vector.broadcast %cst_39 : f32 to vector<8x8xf32>
    %122 = arith.cmpf ogt, %120, %121 : vector<8x8xf32>
    %123 = math.exp %120 : vector<8x8xf32>
    %cst_40 = arith.constant 1.000000e+00 : f32
    %124 = vector.broadcast %cst_40 : f32 to vector<8x8xf32>
    %125 = arith.subf %123, %124 : vector<8x8xf32>
    %126 = arith.select %122, %120, %125 : vector<8x8xi1>, vector<8x8xf32>
    %127 = tpu.concatenate %42, %70, %98, %126 in 1 : vector<8x8xf32>, vector<8x8xf32>, vector<8x8xf32>, vector<8x8xf32> -> vector<8x32xf32>
    %c0_41 = arith.constant 0 : index
    %c0_42 = arith.constant 0 : index
    %128 = vector.load %arg5[%c0_41, %c0_42] : memref<32x128xf32, #tpu.memory_space<vmem>>, vector<32x128xf32>
    %cst_43 = arith.constant dense<0.000000e+00> : vector<8x128xf32>
    %129 = tpu.matmul %127, %128, %cst_43 {dimension_numbers = #tpu.dot_dimension_numbers<[1], [0], [0], [1], [0, 0, 1, 1], [], []>} : vector<8x32xf32>, vector<32x128xf32>, vector<8x128xf32> -> vector<8x128xf32>
    %c0_44 = arith.constant 0 : index
    %c0_45 = arith.constant 0 : index
    %130 = vector.load %arg6[%c0_44, %c0_45] : memref<128x2xf32, #tpu.memory_space<vmem>>, vector<128x2xf32>
    %cst_46 = arith.constant dense<0.000000e+00> : vector<8x2xf32>
    %131 = tpu.matmul %129, %130, %cst_46 {dimension_numbers = #tpu.dot_dimension_numbers<[1], [0], [0], [1], [0, 0, 1, 1], [], []>} : vector<8x128xf32>, vector<128x2xf32>, vector<8x2xf32> -> vector<8x2xf32>
    %132 = tpu.transpose %131, [1, 0] : vector<8x2xf32> -> vector<2x8xf32>
    %133 = vector.extract_strided_slice %131 {offsets = [0, 0], sizes = [8, 1], strides = [1, 1]} : vector<8x2xf32> to vector<8x1xf32>
    %134 = vector.extract_strided_slice %132 {offsets = [1, 0], sizes = [1, 8], strides = [1, 1]} : vector<2x8xf32> to vector<1x8xf32>
    %135 = vector.broadcast %133 : vector<8x1xf32> to vector<8x8xf32>
    %136 = vector.broadcast %134 : vector<1x8xf32> to vector<8x8xf32>
    %137 = arith.addf %135, %136 : vector<8x8xf32>
    %cst_47 = arith.constant 2.000000e-01 : f32
    %138 = vector.broadcast %cst_47 : f32 to vector<8x8xf32>
    %139 = arith.mulf %138, %137 : vector<8x8xf32>
    %140 = arith.maximumf %137, %139 : vector<8x8xf32>
    %141 = arith.addf %140, %14 : vector<8x8xf32>
    %cst_48 = arith.constant dense<0xFF800000> : vector<8xf32>
    %142 = vector.multi_reduction <maximumf>, %141, %cst_48 [1] : vector<8x8xf32> to vector<8xf32>
    %143 = vector.shape_cast %142 : vector<8xf32> to vector<8x1xf32>
    %144 = vector.broadcast %143 : vector<8x1xf32> to vector<8x8xf32>
    %145 = arith.subf %141, %144 : vector<8x8xf32>
    %146 = math.exp %145 : vector<8x8xf32>
    %cst_49 = arith.constant dense<0.000000e+00> : vector<8xf32>
    %147 = vector.multi_reduction <add>, %146, %cst_49 [1] : vector<8x8xf32> to vector<8xf32>
    %148 = vector.shape_cast %147 : vector<8xf32> to vector<8x1xf32>
    %cst_50 = arith.constant 1.000000e+00 : f32
    %149 = vector.broadcast %cst_50 : f32 to vector<8x1xf32>
    %150 = arith.divf %149, %148 : vector<8x1xf32>
    %cst_51 = arith.constant dense<0.000000e+00> : vector<8x128xf32>
    %151 = tpu.matmul %146, %129, %cst_51 {dimension_numbers = #tpu.dot_dimension_numbers<[1], [0], [0], [1], [0, 0, 1, 1], [], []>} : vector<8x8xf32>, vector<8x128xf32>, vector<8x128xf32> -> vector<8x128xf32>
    %152 = vector.broadcast %150 : vector<8x1xf32> to vector<8x128xf32>
    %153 = arith.mulf %151, %152 : vector<8x128xf32>
    %cst_52 = arith.constant 0.000000e+00 : f32
    %154 = vector.broadcast %cst_52 : f32 to vector<8x128xf32>
    %155 = arith.cmpf ogt, %153, %154 : vector<8x128xf32>
    %156 = math.exp %153 : vector<8x128xf32>
    %cst_53 = arith.constant 1.000000e+00 : f32
    %157 = vector.broadcast %cst_53 : f32 to vector<8x128xf32>
    %158 = arith.subf %156, %157 : vector<8x128xf32>
    %159 = arith.select %155, %153, %158 : vector<8x128xi1>, vector<8x128xf32>
    %cst_54 = arith.constant dense<0xFF800000> : vector<128xf32>
    %160 = vector.multi_reduction <maximumf>, %159, %cst_54 [0] : vector<8x128xf32> to vector<128xf32>
    %161 = vector.shape_cast %160 : vector<128xf32> to vector<1x128xf32>
    %162 = vector.broadcast %161 : vector<1x128xf32> to vector<8x128xf32>
    %163 = arith.subf %159, %162 : vector<8x128xf32>
    %164 = math.exp %163 : vector<8x128xf32>
    %cst_55 = arith.constant dense<0.000000e+00> : vector<128xf32>
    %165 = vector.multi_reduction <add>, %164, %cst_55 [0] : vector<8x128xf32> to vector<128xf32>
    %166 = vector.shape_cast %165 : vector<128xf32> to vector<1x128xf32>
    %167 = math.log %166 : vector<1x128xf32>
    %168 = arith.addf %167, %161 : vector<1x128xf32>
    %169 = vector.broadcast %168 : vector<1x128xf32> to vector<8x128xf32>
    %170 = arith.subf %159, %169 : vector<8x128xf32>
    %c0_56 = arith.constant 0 : index
    %c0_57 = arith.constant 0 : index
    %c0_58 = arith.constant 0 : index
    %171 = vector.load %arg7[%c0_56, %c0_57, %c0_58] : memref<1x8x128xf32, #tpu.memory_space<vmem>>, vector<1x8x128xf32>
    %172 = vector.shape_cast %171 : vector<1x8x128xf32> to vector<8x128xf32>
    %173 = vector.shape_cast %170 : vector<8x128xf32> to vector<1x8x128xf32>
    tpu.vector_store %arg7[%c0_56, %c0_57, %c0_58], %173 {strides = array<i32>} : memref<1x8x128xf32, #tpu.memory_space<vmem>>, vector<1x8x128xf32>,
    return
  }
  func.func @transform_0(%arg0: i32) -> (i32, i32, i32) {
    %c0_i32 = arith.constant 0 : i32
    %c0_i32_0 = arith.constant 0 : i32
    %c0_i32_1 = arith.constant 0 : i32
    return %arg0, %c0_i32, %c0_i32_0 : i32, i32, i32
  }
  func.func @transform_1(%arg0: i32) -> (i32, i32, i32) {
    %c0_i32 = arith.constant 0 : i32
    %c0_i32_0 = arith.constant 0 : i32
    %c0_i32_1 = arith.constant 0 : i32
    return %arg0, %c0_i32, %c0_i32_0 : i32, i32, i32
  }
  func.func @transform_2(%arg0: i32) -> (i32, i32) {
    %c0_i32 = arith.constant 0 : i32
    %c0_i32_0 = arith.constant 0 : i32
    %c0_i32_1 = arith.constant 0 : i32
    return %c0_i32, %c0_i32_0 : i32, i32
  }
  func.func @transform_3(%arg0: i32) -> (i32, i32) {
    %c0_i32 = arith.constant 0 : i32
    %c0_i32_0 = arith.constant 0 : i32
    %c0_i32_1 = arith.constant 0 : i32
    return %c0_i32, %c0_i32_0 : i32, i32
  }
  func.func @transform_4(%arg0: i32) -> (i32, i32) {
    %c0_i32 = arith.constant 0 : i32
    %c0_i32_0 = arith.constant 0 : i32
    %c0_i32_1 = arith.constant 0 : i32
    return %c0_i32, %c0_i32_0 : i32, i32
  }
  func.func @transform_5(%arg0: i32) -> (i32, i32) {
    %c0_i32 = arith.constant 0 : i32
    %c0_i32_0 = arith.constant 0 : i32
    %c0_i32_1 = arith.constant 0 : i32
    return %c0_i32, %c0_i32_0 : i32, i32
  }
  func.func @transform_6(%arg0: i32) -> (i32, i32, i32) {
    %c0_i32 = arith.constant 0 : i32
    %c0_i32_0 = arith.constant 0 : i32
    %c0_i32_1 = arith.constant 0 : i32
    return %arg0, %c0_i32, %c0_i32_0 : i32, i32, i32
  }
}

</mosaic_0001>

<bundles_post_ra>
// kernel: gat_forward.1
= control target key start
LH: loop header
LB: loop body
LE: loop exit
PB: predicated region body
PF: predicated region fallthrough
CT: control target
= control target key end

     0   :  { %11 = vsyncpa [#allocation3], 0  ;;  %s1319_s0 = inlined_call_operand.vmem [shape: f32[2,8,16], index: 0, kind: input, shape index: {}]   ;;  %s1320_s1 = inlined_call_operand.vmem [shape: bf16[2,8,8], index: 1, kind: input, shape index: {}]   ;;  %s1321_s2 = inlined_call_operand.vmem [shape: f32[16,32], index: 2, kind: input, shape index: {}]   ;;  %s1322_s3 = inlined_call_operand.vmem [shape: f32[32,8], index: 3, kind: input, shape index: {}]   ;;  %s1323_s4 = inlined_call_operand.vmem [shape: f32[32,128], index: 4, kind: input, shape index: {}]   ;;  %s1324_s5 = inlined_call_operand.vmem [shape: f32[128,2], index: 5, kind: input, shape index: {}]   ;;  %s1325_s6 = inlined_call_operand.hbm [shape: f32[2,8,128], index: 6, kind: output, shape index: {}]  }
   0x1   :  { %13 = vsyncpa [#allocation3 + $0x1], 0  ;;  %s1119_s21 = smov 0   ;;  %s1121_s22 = smov 0  }
   0x2   :  { %s1123_s23 = smov 0   ;;  %s1125_s24 = smov 0  }
   0x3 LB: > { %s1140_s25 = sadd.s32 4294967295, %s1071_s24   ;;  %s895_s26 = sadd.s32 4294967294, %s1071_s24   ;;  %s1071_s24 = sphi %s1125_s24, %s1331_s24   ;;  %s1067_s23 = sphi %s1123_s23, %s1330_s23   ;;  %s1063_s22 = sphi %s1121_s22, %s1329_s22   ;;  %s1059_s21 = sphi %s1119_s21, %s1328_s21  }
   0x4   : > { %s1144_s27 = sadd.s32 1, %s1071_s24   ;;  %s162_s28 = sadd.s32 1, %s1067_s23 }
   0x5   : > { %s159_s29 = ssub.s32 %s1071_s24, %s1144_s27  ;;  %p172_p0 = scmp.ne.s32.totalorder %s1067_s23, %s1063_s22 }
   0x6   : > { %p160_p1 = scmp.eq.s32.totalorder %s159_s29, 0  ;;  %p173_p2 = scmp.eq.s32.totalorder %s1140_s25, 1 }
   0x7   : > { %p178_p3 = scmp.ne.s32.totalorder %s1063_s22, %s1059_s21  ;;  %p179_p4 = scmp.eq.s32.totalorder %s895_s26, 1 }
   0x8   : > { %s1155_s30 = scalar_select %p160_p1, %s1067_s23, %s162_s28  }
   0x9   : > { %p1157_p5 = por %p173_p2, %p172_p0  ;;  %p1161_p6 = por %p179_p4, %p178_p3 }
   0xa   : > { %p898_p7 = scmp.ge.s32.totalorder %s1071_s24, 1  ;;  %p223_p8 = scmp.lt.s32.totalorder %s1071_s24, 3 }
   0xc   : > { %p224_p9 = pnand %p898_p7, %p223_p8 }
   0xd   : > { %p256_p10 = scmp.lt.s32.totalorder (!%p224_p9), %s1140_s25, 1  ;;  %s1077_s11 = smov (!%p224_p9), 120  }
   0xe   : > { %227 = sbr.rel (%p224_p9) target bundleno = 1614 (0x64e), region = 44  ;;  %s1079_s16 = smov (!%p224_p9), 104  }
   0xf   : > { %s1081_s18 = smov (!%p224_p9), 8   ;;  %s1082_s19 = smov (!%p224_p9), 24  }
  0x10   : > { %s1029_s14 = scalar_lea.hbm (!%p224_p9), %s1325_s6, 16 }
  0x13   : > { %v266_v0 = vld [vmem:[%s1321_s2 + $0x8] sm:$0xff]  ;;  %v265_v1 = vld [vmem:[%s1321_s2] sm:$0xff]  ;;  %v294_v2 = vld [vmem:[%s1322_s3 + $0x18] sm:$0xff]  ;;  %s1181_s17 = scalar_select %p256_p10, %s1140_s25, 1  ;;  %vm267_vm0 = vcmask 130048   ;;  %v1073_v7 = vmov 2  }
  0x14   : > { %285 = vmatpush.msra.mxu0 %v266_v0  ;;  %v293_v3 = vld [vmem:[%s1322_s3 + $0x10] sm:$0xff]  ;;  %311 = vmatpush.msra.mxu3 %v294_v2  ;;  %v292_v4 = vld [vmem:[%s1322_s3 + $0x8] sm:$0xff]  ;;  %v291_v6 = vld [vmem:[%s1322_s3] sm:$0xff]  ;;  %v1074_v8 = vmov 0   ;;  %vm295_vm1 = vcmask 261120   ;;  %v1075_v11 = vmov 3  }
  0x15   : > { %s900_s20 = sshll.u32 %s1181_s17, 3  ;;  %972 = vset.pattern.permute.xlu1 %v1073_v7  ;;  %970 = vset.pattern.permute.xlu0 %v1074_v8  ;;  %v1076_v12 = vmov 1   ;;  %s901_s12 = sshll.u32 %s1181_s17, 2  ;;  %v1078_v32 = vmov -9e+15   ;;  %vm365_vm3 = vcmask 64512  }
  0x16   : > { %286 = vmatpush.msra.mxu0 %v265_v1  ;;  %312 = vmatpush.msra.mxu3 %v293_v3  ;;  %s259_s29 = scalar_lea.vmem %s1319_s0, %s900_s20  ;;  %s263_s15 = scalar_lea.vmem %s1320_s1, %s901_s12 }
  0x17   : > { %v264_v5 = vld [vmem:[%s259_s29] sm:$0xff]  ;;  %s1080_s17 = smov 112   ;;  %s1083_s20 = smov 16  }
  0x18   : > { %313 = vmatpush.msra.mxu3 %v292_v4  ;;  %902 = vmatmul.msk.f32.vlgmr.msra.gmra.mxu0 %vm267_vm0, %v264_v5  ;;  %v351_v17 = vld [vmem:[%s263_s15] sm:$0xf] }
  0x19   : > { %v352_v18 = vunpack.c.l.bf16 %v351_v17 }
  0x1a   : > { %314 = vmatpush.msra.mxu3 %v291_v6 }
  0x1b   : > { %vm353_vm2 = vcmp.gt.f32.partialorder %v352_v18, 0.0 }
  0x1c   : > { %v1199_v33 = vsel %vm353_vm2, 0.0, %v1078_v32 }
  0x95   : > { %v288_v9 = vpop.f32.mrf.mxu0 }
  0x96   : > { %903 = vmatmul.msk.f32.vlgmr.msra.gmra.mxu3 %vm295_vm1, %v288_v9  ;;  %408 = vmatpush.msra.mxu2 %v288_v9 }
 0x119   : > { %v316_v10 = vpop.f32.mrf.mxu3 }
 0x11a   : > { %319 = vxpose.xlu2.b32.start.end [1/1] (short) (narrow) %v316_v10, 8  ;;  %485 = vperm.xlu1 %972, %v316_v10  }
 0x11b   : > { %357 = vperm.xlu0 %970, %v316_v10  }
 0x122   : > { %973 = vset.pattern.permute.xlu1 %v1075_v11 }
 0x123   : > { %971 = vset.pattern.permute.xlu0 %v1076_v12  ;;  %550 = vperm.xlu1 %973, %v316_v10  }
 0x124   : > { %420 = vperm.xlu0 %971, %v316_v10  }
 0x12c   : > { %452 = vrot.lane.b32.xlu0 %v288_v9, %s1077_s11 }
 0x12d   : > { %974 = vset.pattern.permute.xlu0 %v1074_v8 }
 0x18c   : > { %v486_v16 = vpop.permute.xlu1 %485 }
 0x18d   : > { %v358_v13 = vpop.permute.xlu0 %357 }
 0x195   : > { %v551_v24 = vpop.permute.xlu1 %550 }
 0x196   : > { %v421_v14 = vpop.permute.xlu0 %420 }
 0x19e   : > { %v453_v15 = vpop.permute.xlu0 %452 }
 0x19f   : > { %473 = vmatpush.msrb.mxu3 %v453_v15 }
 0x1b3   : > { %v335_v19 = vpop.trf.xlu2 }
 0x1b4   : > { %v360_v20 = vperm.slane %v335_v19, 4  ;;  %v423_v21 = vperm.slane %v335_v19, 5  ;;  %v488_v22 = vperm.slane %v335_v19, 6  ;;  %v553_v23 = vperm.slane %v335_v19, 7 }
 0x1b6   : > { %v489_v25 = vadd.f32 %v488_v22, %v486_v16  ;;  %v361_v26 = vadd.f32 %v360_v20, %v358_v13  ;;  %v424_v27 = vadd.f32 %v423_v21, %v421_v14  ;;  %v554_v28 = vadd.f32 %v553_v23, %v551_v24 }
 0x1b8   : > { %v490_v29 = vmul.f32 0.2, %v489_v25  ;;  %v362_v30 = vmul.f32 0.2, %v361_v26  ;;  %v425_v31 = vmul.f32 0.2, %v424_v27 }
 0x1b9   : > { %v555_v37 = vmul.f32 0.2, %v554_v28 }
 0x1ba   : > { %v491_v34 = vmax.f32 %v489_v25, %v490_v29  ;;  %v363_v35 = vmax.f32 %v361_v26, %v362_v30  ;;  %v426_v36 = vmax.f32 %v424_v27, %v425_v31 }
 0x1bb   : > { %v556_v44 = vmax.f32 %v554_v28, %v555_v37 }
 0x1bc   : > { %v492_v38 = vadd.f32 %v491_v34, %v1199_v33  ;;  %v364_v39 = vadd.f32 %v363_v35, %v1199_v33  ;;  %v427_v40 = vadd.f32 %v426_v36, %v1199_v33 }
 0x1bd   : > { %v557_v45 = vadd.f32 %v556_v44, %v1199_v33 }
 0x1be   : > { %v493_v41 = vsel %vm365_vm3, %v492_v38, -inf  ;;  %v366_v42 = vsel %vm365_vm3, %v364_v39, -inf  ;;  %v428_v43 = vsel %vm365_vm3, %v427_v40, -inf }
 0x1bf   : > { %494 = vmax.xlane.f32.xlu0 %v493_v41  ;;  %367 = vmax.xlane.f32.xlu2 %v366_v42  ;;  %v558_v46 = vsel %vm365_vm3, %v557_v45, -inf }
 0x1c0   : > { %429 = vmax.xlane.f32.xlu1 %v428_v43 }
 0x1c8   : > { %559 = vmax.xlane.f32.xlu1 %v558_v46 }
 0x1d3   : > { %582 = vrot.lane.b32.xlu0 %v288_v9, %s1079_s16  ;;  %s253_s16 = sand.u32 1, %s1063_s22  }
 0x1d4   : > { %s809_s10 = scalar_lea.sflag [#allocation3], %s253_s16 }
 0x1e1   : > { %517 = vrot.lane.b32.xlu1 %v288_v9, %s1080_s17  ;;  %s899_s17 = sshll.u32 %s253_s16, 3 }
 0x1e2   : > { %s255_s28 = scalar_lea.vmem [#allocation2], %s899_s17 }
 0x1e3   : > { %s821_s29 = sshll.u32 %s255_s28, 4  ;;  %s822_s29 = int_to_ptr.vmem [resolvable:$true] %s821_s29 }
 0x232   : > { %v368_v47 = vpop.xlane.xlu2 %367  ;;  %v495_v48 = vpop.xlane.xlu0 %494 }
 0x233   : > { %v369_v49 = vsub.f32 %v364_v39, %v368_v47  ;;  %v430_v50 = vpop.xlane.xlu1 %429  ;;  %v496_v51 = vsub.f32 %v492_v38, %v495_v48 }
 0x234   : > { %v431_v52 = vsub.f32 %v427_v40, %v430_v50 }
 0x235   : > { %v370_v53 = vmul.f32 1.442695, %v369_v49  ;;  %v497_v54 = vmul.f32 1.442695, %v496_v51 }
 0x236   : > { %v432_v55 = vmul.f32 1.442695, %v431_v52 }
 0x237   : > { %975 = vpow2.f32 %v370_v53 }
 0x238   : > { %977 = vpow2.f32 %v432_v55 }
 0x239   : > { %979 = vpow2.f32 %v497_v54 }
 0x23b   : > { %v560_v56 = vpop.xlane.xlu1 %559 }
 0x23c   : > { %v561_v57 = vsub.f32 %v557_v45, %v560_v56 }
 0x23d   : > { %v976_v58 = vpop.eup %975 }
 0x23e   : > { %v978_v59 = vpop.eup %977  ;;  %v562_v60 = vmul.f32 1.442695, %v561_v57  ;;  %904 = vmatmul.msk.f32.vlgmr.msra.gmra.mxu2 %vm365_vm3, %v976_v58  ;;  %v372_v3 = vsel %vm365_vm3, %v976_v58, 0.0 }
 0x23f   : > { %v980_v61 = vpop.eup %979  ;;  %906 = vmatmul.msk.f32.vlgmr.msrb.gmra.mxu3 %vm365_vm3, %v978_v59  ;;  %v434_v62 = vsel %vm365_vm3, %v978_v59, 0.0  ;;  %v633_v59 = vld [vmem:[%s1323_s4 + $0x18] sm:$0xff] }
 0x240   : > { %981 = vpow2.f32 %v562_v60  ;;  %435 = vadd.xlane.f32.xlu1 %v434_v62  ;;  %v499_v63 = vsel %vm365_vm3, %v980_v61, 0.0  ;;  %v632_v60 = vld [vmem:[%s1323_s4 + $0x10] sm:$0xff]  ;;  %649 = vmatpush.msrb.mxu0 %v633_v59 }
 0x241   : > { %500 = vadd.xlane.f32.xlu0 %v499_v63 }
 0x242   : > { %650 = vmatpush.msrb.mxu0 %v632_v60 }
 0x245   : > { %v583_v0 = vpop.permute.xlu0 %582 }
 0x246   : > { %v982_v1 = vpop.eup %981  ;;  %603 = vmatpush.msra.mxu3 %v583_v0 }
 0x247   : > { %v564_v2 = vsel %vm365_vm3, %v982_v1, 0.0  ;;  %910 = vmatmul.msk.f32.vlgmr.msra.gmra.mxu3 %vm365_vm3, %v982_v1 }
 0x248   : > { %565 = vadd.xlane.f32.xlu2 %v564_v2 }
 0x250   : > { %373 = vadd.xlane.f32.xlu2 %v372_v3 }
 0x253   : > { %v518_v4 = vpop.permute.xlu1 %517 }
 0x254   : > { %538 = vmatpush.msrb.mxu2 %v518_v4  ;;  %v630_v4 = vld [vmem:[%s1323_s4] sm:$0xff] }
 0x255   : > { %908 = vmatmul.msk.f32.vlgmr.msrb.gmra.mxu2 %vm365_vm3, %v980_v61  ;;  %v631_v61 = vld [vmem:[%s1323_s4 + $0x8] sm:$0xff] }
 0x256   : > { %651 = vmatpush.msrb.mxu0 %v631_v61 }
 0x258   : > { %652 = vmatpush.msrb.mxu0 %v630_v4 }
 0x2b3   : > { %v436_v5 = vpop.xlane.xlu1 %435 }
 0x2b4   : > { %983 = vrcp.f32 %v436_v5  ;;  %v501_v6 = vpop.xlane.xlu0 %500  ;;  %v448_v11 = vand.u32 2147483648, %v436_v5  ;;  %v446_v13 = vand.u32 2147483647, %v436_v5  ;;  %vm442_vm5 = vweird.f32 %v436_v5 }
 0x2b5   : > { %985 = vrcp.f32 %v501_v6  ;;  %v513_v44 = vand.u32 2147483648, %v501_v6  ;;  %vm507_vm14 = vweird.f32 %v501_v6  ;;  %v511_v45 = vand.u32 2147483647, %v501_v6 }
 0x2b6   : > { %v449_v17 = vor.u32 1.1754944e-38, %v448_v11  ;;  %vm447_vm7 = vcmp.eq.f32.partialorder %v446_v13, 8.507059e+37  ;;  %v668_v13 = vld [vmem:[%s1324_s5 + $0x58] sm:$0xff] }
 0x2b7   : > { %v514_v47 = vor.u32 1.1754944e-38, %v513_v44  ;;  %vm512_vm2 = vcmp.eq.f32.partialorder %v511_v45, 8.507059e+37 }
 0x2ba   : > { %v984_v7 = vpop.eup %983 }
 0x2bb   : > { %v438_v8 = vmul.f32 %v984_v7, %v436_v5  ;;  %v566_v9 = vpop.xlane.xlu2 %565  ;;  %vm443_vm4 = vweird.f32 %v984_v7  ;;  %v986_v14 = vpop.eup %985 }
 0x2bc   : > { %987 = vrcp.f32 %v566_v9  ;;  %vm444_vm6 = vmor %vm442_vm5, %vm443_vm4  ;;  %v503_v22 = vmul.f32 %v986_v14, %v501_v6  ;;  %v578_v25 = vand.u32 2147483648, %v566_v9  ;;  %v576_v28 = vand.u32 2147483647, %v566_v9  ;;  %v672_v6 = vld [vmem:[%s1324_s5 + $0x78] sm:$0xff] }
 0x2bd   : > { %v439_v10 = vsub.f32 1.0, %v438_v8  ;;  %vm572_vm9 = vweird.f32 %v566_v9  ;;  %vm508_vm13 = vweird.f32 %v986_v14  ;;  %673 = vmatpush.msra.mxu1 %v672_v6 }
 0x2be   : > { %v504_v29 = vsub.f32 1.0, %v503_v22  ;;  %v579_v31 = vor.u32 1.1754944e-38, %v578_v25  ;;  %vm577_vm11 = vcmp.eq.f32.partialorder %v576_v28, 8.507059e+37  ;;  %vm509_vm15 = vmor %vm507_vm14, %vm508_vm13  ;;  %v661_v22 = vld [vmem:[%s1324_s5 + $0x20] sm:$0xff]  ;;  %v658_v28 = vld [vmem:[%s1324_s5 + $0x8] sm:$0xff] }
 0x2bf   : > { %v440_v12 = vmul.f32 %v984_v7, %v439_v10  ;;  %v670_v10 = vld [vmem:[%s1324_s5 + $0x68] sm:$0xff] }
 0x2c0   : > { %v505_v37 = vmul.f32 %v986_v14, %v504_v29 }
 0x2c1   : > { %v441_v15 = vadd.f32 %v984_v7, %v440_v12  ;;  %v1217_v40 = vpop.f32.mrf.mxu2  ;;  %v669_v12 = vld [vmem:[%s1324_s5 + $0x60] sm:$0xff] }
 0x2c2   : > { %v988_v16 = vpop.eup %987  ;;  %v475_v18 = vpop.f32.mrf.mxu3  ;;  %v506_v42 = vadd.f32 %v986_v14, %v505_v37 }
 0x2c3   : > { %v568_v19 = vmul.f32 %v988_v16, %v566_v9  ;;  %v445_v20 = vsel %vm444_vm6, %v984_v7, %v441_v15  ;;  %vm573_vm8 = vweird.f32 %v988_v16  ;;  %v374_v58 = vpop.xlane.xlu2 %373  ;;  %v671_v7 = vld [vmem:[%s1324_s5 + $0x70] sm:$0xff] }
 0x2c4   : > { %v450_v21 = vsel %vm447_vm7, %v449_v17, %v445_v20  ;;  %vm574_vm10 = vmor %vm572_vm9, %vm573_vm8  ;;  %v510_v46 = vsel %vm509_vm15, %v986_v14, %v506_v42  ;;  %v386_v3 = vand.u32 2147483648, %v374_v58  ;;  %vm380_vm7 = vweird.f32 %v374_v58  ;;  %674 = vmatpush.msra.mxu1 %v671_v7  ;;  %v667_v15 = vld [vmem:[%s1324_s5 + $0x50] sm:$0xff] }
 0x2c5   : > { %v569_v23 = vsub.f32 1.0, %v568_v19  ;;  %v478_v24 = vmul.f32 %v475_v18, %v450_v21  ;;  %v515_v49 = vsel %vm512_vm2, %v514_v47, %v510_v46  ;;  %v384_v5 = vand.u32 2147483647, %v374_v58  ;;  %v665_v18 = vld [vmem:[%s1324_s5 + $0x40] sm:$0xff]  ;;  %v664_v19 = vld [vmem:[%s1324_s5 + $0x38] sm:$0xff]  ;;  %v663_v20 = vld [vmem:[%s1324_s5 + $0x30] sm:$0xff] }
 0x2c6   : > { %v387_v9 = vor.u32 1.1754944e-38, %v386_v3  ;;  %675 = vmatpush.msra.mxu1 %v670_v10  ;;  %v662_v21 = vld [vmem:[%s1324_s5 + $0x28] sm:$0xff] }
 0x2c7   : > { %v480_v26 = vmul.f32 1.442695, %v478_v24  ;;  %v570_v27 = vmul.f32 %v988_v16, %v569_v23  ;;  %vm479_vm12 = vcmp.gt.f32.partialorder %v478_v24, 0.0  ;;  %vm385_vm9 = vcmp.eq.f32.partialorder %v384_v5, 8.507059e+37 }
 0x2c8   : > { %676 = vmatpush.msra.mxu1 %v669_v12 }
 0x2c9   : > { %989 = vpow2.f32 %v480_v26  ;;  %v571_v30 = vadd.f32 %v988_v16, %v570_v27  ;;  %v659_v26 = vld [vmem:[%s1324_s5 + $0x10] sm:$0xff] }
 0x2ca   : > { %v605_v32 = vpop.f32.mrf.mxu3  ;;  %677 = vmatpush.msra.mxu1 %v668_v13 }
 0x2cb   : > { %v575_v34 = vsel %vm574_vm10, %v988_v16, %v571_v30  ;;  %v666_v16 = vld [vmem:[%s1324_s5 + $0x48] sm:$0xff] }
 0x2cc   : > { %v580_v35 = vsel %vm577_vm11, %v579_v31, %v575_v34  ;;  %678 = vmatpush.msra.mxu1 %v667_v15  ;;  %vm628_vm11 = vcmask 195584  }
 0x2cd   : > { %v608_v36 = vmul.f32 %v605_v32, %v580_v35 }
 0x2ce   : > { %679 = vmatpush.msra.mxu1 %v666_v16 }
 0x2cf   : > { %v990_v38 = vpop.eup %989  ;;  %v610_v39 = vmul.f32 1.442695, %v608_v36  ;;  %vm609_vm4 = vcmp.gt.f32.partialorder %v608_v36, 0.0 }
 0x2d0   : > { %v907_v41 = vadd.f32 -1.0, %v990_v38  ;;  %680 = vmatpush.msra.mxu1 %v665_v18 }
 0x2d1   : > { %991 = vpow2.f32 %v610_v39 }
 0x2d2   : > { %v483_v43 = vsel %vm479_vm12, %v478_v24, %v907_v41  ;;  %681 = vmatpush.msra.mxu1 %v664_v19  ;;  %v660_v24 = vld [vmem:[%s1324_s5 + $0x18] sm:$0xff] }
 0x2d3   : > { %615 = vrot.lane.b32.xlu1 %v483_v43, %s1081_s18  ;;  %s916_s18 = sshll.u32 %s1140_s25, 3 }
 0x2d4   : > { %682 = vmatpush.msra.mxu1 %v663_v20  ;;  %s819_s26 = scalar_lea.hbm %s1325_s6, %s916_s18 }
 0x2d5   : > { %s823_s9 = sshll.u32 %s819_s26, 4  ;;  %s824_s9 = int_to_ptr.hbm [resolvable:$true] %s823_s9 }
 0x2d6   : > { %683 = vmatpush.msra.mxu1 %v662_v21  ;;  %s1023_s11 = sshra.s32 %s824_s9, 4  ;;  %s1024_s11 = int_to_ptr.hbm [resolvable:$true] %s1023_s11 }
 0x2d7   : > { %v992_v48 = vpop.eup %991  ;;  %s1025_s12 = scalar_lea.hbm %s1024_s11, 8  ;;  %p1030_p0 = scmp.lt.s32.totalorder %s1024_s11, %s1325_s6 }
 0x2d8   : > { %v540_v50 = vpop.f32.mrf.mxu2  ;;  %v911_v51 = vadd.f32 -1.0, %v992_v48  ;;  %684 = vmatpush.msra.mxu1 %v661_v22  ;;  %p1026_p11 = scmp.ne.s32.totalorder %s1024_s11, %s1025_s12  ;;  %p1031_p1 = scmp.lt.s32.totalorder %s1029_s14, %s1025_s12 }
 0x2d9   : > { %v543_v52 = vmul.f32 %v540_v50, %v515_v49 }
 0x2da   : > { %v613_v53 = vsel %vm609_vm4, %v608_v36, %v911_v51  ;;  %685 = vmatpush.msra.mxu1 %v660_v24  ;;  %v657_v36 = vld [vmem:[%s1324_s5] sm:$0xff]  ;;  %p1027_p12 = pnand %p1026_p11, %p1157_p5  ;;  %p1032_p2 = por %p1031_p1, %p1030_p0 }
 0x2db   : > { %v545_v54 = vmul.f32 1.442695, %v543_v52  ;;  %623 = vrot.lane.b32.xlu2 %v613_v53, %s1082_s19  ;;  %vm544_vm5 = vcmp.gt.f32.partialorder %v543_v52, 0.0 }
 0x2dc   : > { %686 = vmatpush.msra.mxu1 %v659_v26  ;;  %p1028_p13 = pneg %p1027_p12 }
 0x2dd   : > { %993 = vpow2.f32 %v545_v54 }
 0x2de   : > { %995 = vrcp.f32 %v374_v58  ;;  %687 = vmatpush.msra.mxu1 %v658_v28  ;;  %p1033_p3 = pnand %p1032_p2, %p1028_p13 }
 0x2e0   : > { %688 = vmatpush.msra.mxu1 %v657_v36 }
 0x2e3   : > { %v994_v55 = vpop.eup %993 }
 0x2e4   : > { %v909_v56 = vadd.f32 -1.0, %v994_v55  ;;  %v996_v62 = vpop.eup %995 }
 0x2e5   : > { %v376_v63 = vmul.f32 %v996_v62, %v374_v58  ;;  %vm381_vm6 = vweird.f32 %v996_v62 }
 0x2e6   : > { %v548_v57 = vsel %vm544_vm5, %v543_v52, %v909_v56  ;;  %vm382_vm8 = vmor %vm380_vm7, %vm381_vm6 }
 0x2e7   : > { %619 = vrot.lane.b32.xlu0 %v548_v57, %s1083_s20  ;;  %v377_v0 = vsub.f32 1.0, %v376_v63 }
 0x2e9   : > { %v378_v1 = vmul.f32 %v996_v62, %v377_v0 }
 0x2eb   : > { %v379_v2 = vadd.f32 %v996_v62, %v378_v1 }
 0x2ed   : > { %v383_v8 = vsel %vm382_vm8, %v996_v62, %v379_v2 }
 0x2ee   : > { %v388_v11 = vsel %vm385_vm9, %v387_v9, %v383_v8 }
 0x2ef   : > { %v413_v14 = vmul.f32 %v1217_v40, %v388_v11 }
 0x2f1   : > { %v415_v17 = vmul.f32 1.442695, %v413_v14  ;;  %vm414_vm10 = vcmp.gt.f32.partialorder %v413_v14, 0.0 }
 0x2f3   : > { %997 = vpow2.f32 %v415_v17 }
 0x2f9   : > { %v998_v23 = vpop.eup %997 }
 0x2fa   : > { %v905_v25 = vadd.f32 -1.0, %v998_v23 }
 0x2fc   : > { %v418_v29 = vsel %vm414_vm10, %v413_v14, %v905_v25 }
 0x335   : > { %v624_v32 = vpop.permute.xlu2 %623 }
 0x345   : > { %v616_v27 = vpop.permute.xlu1 %615 }
 0x346   : > { %v626_v30 = vsel %vm365_vm3, %v418_v29, %v616_v27 }
 0x359   : > { %v620_v31 = vpop.permute.xlu0 %619 }
 0x35a   : > { %v627_v34 = vsel %vm267_vm0, %v626_v30, %v620_v31 }
 0x35b   : > { %v629_v35 = vsel %vm628_vm11, %v627_v34, %v624_v32 }
 0x35c   : > { %912 = vmatmul.msk.f32.vlgmr.msrb.gmra.mxu0 %vm295_vm1, %v629_v35 }
 0x3d9   : > { %v654_v37 = vpop.f32.mrf.mxu0 }
 0x3da   : > { %689 = vmatmul.f32.vlgmr.msra.gmra.mxu1 %v654_v37  ;;  %777 = vmatpush.msra.mxu2 %v654_v37 }
 0x457   : > { %v690_v38 = vpop.f32.mrf.mxu1 }
 0x458   : > { %693 = vxpose.xlu1.b32.start.end [1/1] (short) (narrow) %v690_v38, 8  ;;  %727 = vperm.xlu0 %974, %v690_v38  }
 0x4ca   : > { %v728_v41 = vpop.permute.xlu0 %727 }
 0x4fc   : > { %v709_v39 = vpop.trf.xlu1 }
 0x4fd   : > { %v730_v40 = vperm.slane %v709_v39, 1 }
 0x4ff   : > { %v731_v42 = vadd.f32 %v730_v40, %v728_v41 }
 0x501   : > { %v732_v43 = vmul.f32 0.2, %v731_v42 }
 0x503   : > { %v733_v44 = vmax.f32 %v731_v42, %v732_v43 }
 0x505   : > { %v734_v45 = vadd.f32 %v733_v44, %v1199_v33 }
 0x507   : > { %v735_v46 = vsel %vm365_vm3, %v734_v45, -inf }
 0x508   : > { %736 = vmax.xlane.f32.xlu2 %v735_v46 }
 0x57b   : > { %v737_v47 = vpop.xlane.xlu2 %736 }
 0x57c   : > { %v738_v48 = vsub.f32 %v734_v45, %v737_v47 }
 0x57e   : > { %v739_v49 = vmul.f32 1.442695, %v738_v48 }
 0x580   : > { %999 = vpow2.f32 %v739_v49 }
 0x586   : > { %v1000_v50 = vpop.eup %999 }
 0x587   : > { %913 = vmatmul.msk.f32.vlgmr.msra.gmra.mxu2 %vm365_vm3, %v1000_v50  ;;  %v741_v51 = vsel %vm365_vm3, %v1000_v50, 0.0 }
 0x588   : > { %742 = vadd.xlane.f32.xlu0 %v741_v51 }
 0x5fb   : > { %v743_v52 = vpop.xlane.xlu0 %742 }
 0x5fc   : > { %1001 = vrcp.f32 %v743_v52  ;;  %v755_v56 = vand.u32 2147483648, %v743_v52  ;;  %v753_v57 = vand.u32 2147483647, %v743_v52  ;;  %vm749_vm1 = vweird.f32 %v743_v52 }
 0x5fe   : > { %v756_v59 = vor.u32 1.1754944e-38, %v755_v56  ;;  %vm754_vm13 = vcmp.eq.f32.partialorder %v753_v57, 8.507059e+37 }
 0x602   : > { %v1002_v53 = vpop.eup %1001 }
 0x603   : > { %v745_v54 = vmul.f32 %v1002_v53, %v743_v52  ;;  %vm750_vm0 = vweird.f32 %v1002_v53 }
 0x604   : > { %vm751_vm12 = vmor %vm749_vm1, %vm750_vm0 }
 0x605   : > { %v746_v55 = vsub.f32 1.0, %v745_v54 }
 0x607   : > { %v747_v33 = vmul.f32 %v1002_v53, %v746_v55 }
 0x609   : > { %v748_v58 = vadd.f32 %v1002_v53, %v747_v33 }
 0x60a   : > { %v779_v62 = vpop.f32.mrf.mxu2 }
 0x60b   : > { %v752_v60 = vsel %vm751_vm12, %v1002_v53, %v748_v58 }
 0x60c   : > { %v757_v61 = vsel %vm754_vm13, %v756_v59, %v752_v60 }
 0x60d   : > { %v782_v63 = vmul.f32 %v779_v62, %v757_v61 }
 0x60f   : > { %v784_v0 = vmul.f32 1.442695, %v782_v63  ;;  %vm783_vm3 = vcmp.gt.f32.partialorder %v782_v63, 0.0 }
 0x611   : > { %1003 = vpow2.f32 %v784_v0 }
 0x617   : > { %v1004_v1 = vpop.eup %1003 }
 0x618   : > { %v914_v2 = vadd.f32 -1.0, %v1004_v1 }
 0x61a   : > { %v787_v3 = vsel %vm783_vm3, %v782_v63, %v914_v2 }
 0x61b   : > { %v788_v4 = vrot.slane %v787_v3, 4 }
 0x61d   : > { %v789_v5 = vmax.f32 %v787_v3, %v788_v4 }
 0x61f   : > { %v790_v6 = vrot.slane %v789_v5, 2 }
 0x621   : > { %v791_v7 = vmax.f32 %v789_v5, %v790_v6 }
 0x623   : > { %v792_v8 = vrot.slane %v791_v7, 1 }
 0x625   : > { %v793_v9 = vmax.f32 %v791_v7, %v792_v8 }
 0x627   : > { %v794_v10 = vsub.f32 %v787_v3, %v793_v9 }
 0x629   : > { %v795_v11 = vmul.f32 1.442695, %v794_v10 }
 0x62b   : > { %1005 = vpow2.f32 %v795_v11 }
 0x631   : > { %v1006_v12 = vpop.eup %1005 }
 0x632   : > { %v797_v13 = vrot.slane %v1006_v12, 4 }
 0x634   : > { %v798_v14 = vadd.f32 %v1006_v12, %v797_v13 }
 0x636   : > { %v799_v15 = vrot.slane %v798_v14, 2 }
 0x638   : > { %v800_v16 = vadd.f32 %v799_v15, %v798_v14 }
 0x63a   : > { %v801_v17 = vrot.slane %v800_v16, 1 }
 0x63c   : > { %v802_v18 = vadd.f32 %v801_v17, %v800_v16 }
 0x63e   : > { %1007 = vlog2.f32 %v802_v18 }
 0x644   : > { %v1008_v19 = vpop.eup %1007 }
 0x645   : > { %v804_v20 = vmul.f32 0.6931472, %v1008_v19 }
 0x647   : > { %v805_v21 = vadd.f32 %v804_v20, %v793_v9 }
 0x649   : > { %v806_v22 = vsub.f32 %v787_v3, %v805_v21 }
 0x64b   : > { %807 = vst [vmem:[%s255_s28] sm:$0xff] %v806_v22 }
 0x64c   : > { %1036 = shalt.err (!%p1033_p3)
}
 0x64d   : > { %919 = dma.vmem_to_hbm [thread:$0]  (%p1157_p5), %s822_s29, 128, %s824_s9, %s809_s10  }
 0x64e PF: > { %p925_p4 = scmp.ge.s32.totalorder %s1071_s24, 2  ;;  %s835_s16 = sand.u32 1, %s1059_s21  }
 0x64f   : > { %s836_s18 = scalar_lea.sflag [#allocation3], %s835_s16 }
 0x650   : > { %p922_p7 = pnand %p925_p4, %p1161_p6 }
 0x652   : > { %p923_p8 = pneg %p922_p7 }
 0x654   : > { %1054 = dma.done.wait (%p923_p8), %s836_s18, 128  }
 0x655   : > { %1056 = vsyncadd (%p923_p8), %s836_s18, 4294967168  ;;  %p16_p9 = scmp.ge.s32.totalorder %s1144_s27, 4   ;;  %s1328_s21 = smov %s1063_s22 }
 0x656   : > { %s1329_s22 = smov %s1067_s23  ;;  %s1330_s23 = smov %s1155_s30 }
 0x657   : > { %s1331_s24 = smov %s1144_s27  ;;  %18 = sbr.rel (!%p16_p9) target bundleno = 3 (0x3), region = 82 }
 0x65c   :  { %842 = vsyncpa [#allocation3], 1 }
 0x65d   :  { %844 = vsyncpa [#allocation3 + $0x1], 1 }

</bundles_post_ra>
